<compile_context>
chip_gen: v6e
topology: v6e:2x2x1
jax: 0.10.0
libtpu: 0.0.40
codegen_flags: <defaults>
</compile_context>

<pallas_src>
import functools

import jax
import jax.numpy as jnp
from jax.experimental import pallas as pl
from jax.experimental.pallas import tpu as pltpu


def _largest_divisor_leq(n, cap):
    cap = max(1, min(n, cap))
    for d in range(cap, 0, -1):
        if n % d == 0:
            return d
    return 1


def _mlp_gate(avg, mx, w1t, b1, w2t, b2):
    """Shared MLP on (rows, C) f32 pooled vectors; Linear->ReLU->Linear per path,
    summed, sigmoid.  fc[2].bias is added once per path (twice total), exactly
    matching the PyTorch module."""
    def mlp(v):
        h = jnp.dot(v, w1t, preferred_element_type=jnp.float32) + b1
        h = jnp.maximum(h, 0.0)
        return jnp.dot(h, w2t, preferred_element_type=jnp.float32) + b2
    return jax.nn.sigmoid(mlp(avg) + mlp(mx))


# ---------------------------------------------------------------------------
# Fast path: one (bt, C, HW) slab per grid step, fully fused.
# ---------------------------------------------------------------------------
def _ca_fused_kernel(x_ref, w1t_ref, b1_ref, w2t_ref, b2_ref, o_ref, *, inv_hw):
    # x_ref / o_ref: (bt, C, HW); weights are tiny f32 tiles.
    # f32 accumulation fused into the reductions -- no full-block f32 copy.
    s = jnp.sum(x_ref[...], axis=-1, dtype=jnp.float32)           # (bt, C)
    m = jnp.max(x_ref[...], axis=-1).astype(jnp.float32)          # exact in-dtype max
    gate = _mlp_gate(s * inv_hw, m,
                     w1t_ref[...], b1_ref[...], w2t_ref[...], b2_ref[...])
    # Gating multiply in the input dtype (packed bf16 on v6e/v7x); only the
    # tiny (bt, C) gate is cast.
    o_ref[...] = x_ref[...] * gate.astype(o_ref.dtype)[:, :, None]


# ---------------------------------------------------------------------------
# Fallback path (large C*H*W): pool+gate over HW chunks, then apply.
# ---------------------------------------------------------------------------
def _ca_pool_gate_kernel(x_ref, w1t_ref, b1_ref, w2t_ref, b2_ref, gate_ref,
                         sum_sc, max_sc, *, hw, hwc, inv_hw):
    j = pl.program_id(1)

    @pl.when(j == 0)
    def _():
        sum_sc[...] = jnp.zeros_like(sum_sc)
        max_sc[...] = jnp.full_like(max_sc, -jnp.inf)

    x = x_ref[...]                                                 # (bt, C, hwc)
    if hw % hwc != 0:
        # Ragged last chunk: tiny (1, 1, hwc) iota mask (no big int32 temps).
        lane = jax.lax.broadcasted_iota(jnp.int32, (1, 1, hwc), 2)
        valid = lane < (hw - j * hwc)
        x_sum = jnp.where(valid, x, 0)
        x_max = jnp.where(valid, x, -jnp.inf)
    else:
        x_sum = x
        x_max = x

    sum_sc[...] = sum_sc[...] + jnp.sum(x_sum, axis=-1, dtype=jnp.float32)
    max_sc[...] = jnp.maximum(max_sc[...],
                              jnp.max(x_max, axis=-1).astype(jnp.float32))

    # Gate is recomputed each chunk (tiny matmuls, hidden under DMA); the
    # resident output block is only written back to HBM after the last chunk,
    # at which point the pools are complete.
    gate = _mlp_gate(sum_sc[...] * inv_hw, max_sc[...],
                     w1t_ref[...], b1_ref[...], w2t_ref[...], b2_ref[...])
    gate_ref[...] = gate[:, :, None]                               # (bt, C, 1) f32


def _ca_apply_kernel(gate_ref, x_ref, o_ref):
    # gate_ref: (bt, C, 1) f32; x_ref / o_ref: (bt, C, hwc)
    o_ref[...] = x_ref[...] * gate_ref[...].astype(o_ref.dtype)


# ---------------------------------------------------------------------------
# Wrapper
# ---------------------------------------------------------------------------
def channel_attention(x, w1, b1, w2, b2, *, block_budget_bytes=3 * 1024 * 1024):
    """x: (B, C, H, W) f32 or bf16.  w1: (Ch, C), b1: (Ch,), w2: (C, Ch), b2: (C,)."""
    B, C, H, W = x.shape
    Ch = w1.shape[0]
    HW = H * W
    itemsize = jnp.dtype(x.dtype).itemsize
    inv_hw = 1.0 / float(HW)

    # Reshape (B, C, H, W) -> (B, C, H*W): trailing-dim merge, no HBM copy.
    x_flat = x.reshape(B, C, HW)
    w1t = jnp.asarray(w1, jnp.float32).T              # (C, Ch)
    w2t = jnp.asarray(w2, jnp.float32).T              # (Ch, C)
    b1r = jnp.asarray(b1, jnp.float32).reshape(1, Ch)
    b2r = jnp.asarray(b2, jnp.float32).reshape(1, C)

    vmem_limit = 32 * 1024 * 1024                      # safe on v5e/v6e/v7x
    per_batch_bytes = C * HW * itemsize

    if per_batch_bytes <= block_budget_bytes:
        # ---------------- fast, fully fused path ----------------
        bt_mem = max(1, block_budget_bytes // per_batch_bytes)
        bt_steps = max(1, B // 8)                      # keep >= ~8 grid steps when B allows
        bt = _largest_divisor_leq(B, min(bt_mem, bt_steps))

        out_flat = pl.pallas_call(
            functools.partial(_ca_fused_kernel, inv_hw=inv_hw),
            out_shape=jax.ShapeDtypeStruct((B, C, HW), x.dtype),
            grid_spec=pltpu.PrefetchScalarGridSpec(
                num_scalar_prefetch=0,
                grid=(B // bt,),
                in_specs=[
                    pl.BlockSpec((bt, C, HW), lambda i: (i, 0, 0)),
                    pl.BlockSpec((C, Ch), lambda i: (0, 0)),
                    pl.BlockSpec((1, Ch), lambda i: (0, 0)),
                    pl.BlockSpec((Ch, C), lambda i: (0, 0)),
                    pl.BlockSpec((1, C), lambda i: (0, 0)),
                ],
                out_specs=pl.BlockSpec((bt, C, HW), lambda i: (i, 0, 0)),
            ),
            compiler_params=pltpu.CompilerParams(
                dimension_semantics=("parallel",),
                vmem_limit_bytes=vmem_limit,
            ),
            cost_estimate=pl.CostEstimate(
                flops=3 * B * C * HW + 8 * B * C * Ch,
                transcendentals=B * C,
                bytes_accessed=2 * B * C * HW * itemsize,
            ),
        )(x_flat, w1t, b1r, w2t, b2r)
        return out_flat.reshape(B, C, H, W)

    # ---------------- chunked fallback path (large C*H*W) ----------------
    bt = 1
    hwc = max(128, (block_budget_bytes // (C * itemsize)) // 128 * 128)
    hwc = min(hwc, max(128, ((HW + 127) // 128) * 128))
    nhw = -(-HW // hwc)

    gate = pl.pallas_call(
        functools.partial(_ca_pool_gate_kernel, hw=HW, hwc=hwc, inv_hw=inv_hw),
        out_shape=jax.ShapeDtypeStruct((B, C, 1), jnp.float32),
        grid_spec=pltpu.PrefetchScalarGridSpec(
            num_scalar_prefetch=0,
            grid=(B // bt, nhw),
            in_specs=[
                pl.BlockSpec((bt, C, hwc), lambda i, j: (i, 0, j)),
                pl.BlockSpec((C, Ch), lambda i, j: (0, 0)),
                pl.BlockSpec((1, Ch), lambda i, j: (0, 0)),
                pl.BlockSpec((Ch, C), lambda i, j: (0, 0)),
                pl.BlockSpec((1, C), lambda i, j: (0, 0)),
            ],
            out_specs=pl.BlockSpec((bt, C, 1), lambda i, j: (i, 0, 0)),
            scratch_shapes=[
                pltpu.VMEM((bt, C), jnp.float32),   # running sum
                pltpu.VMEM((bt, C), jnp.float32),   # running max
            ],
        ),
        compiler_params=pltpu.CompilerParams(
            dimension_semantics=("parallel", "arbitrary"),
            vmem_limit_bytes=vmem_limit,
        ),
    )(x_flat, w1t, b1r, w2t, b2r)

    out_flat = pl.pallas_call(
        _ca_apply_kernel,
        out_shape=jax.ShapeDtypeStruct((B, C, HW), x.dtype),
        grid_spec=pltpu.PrefetchScalarGridSpec(
            num_scalar_prefetch=0,
            grid=(B // bt, nhw),
            in_specs=[
                pl.BlockSpec((bt, C, 1), lambda i, j: (i, 0, 0)),
                pl.BlockSpec((bt, C, hwc), lambda i, j: (i, 0, j)),
            ],
            out_specs=pl.BlockSpec((bt, C, hwc), lambda i, j: (i, 0, j)),
        ),
        compiler_params=pltpu.CompilerParams(
            dimension_semantics=("parallel", "parallel"),
            vmem_limit_bytes=vmem_limit,
        ),
    )(gate, x_flat)
    return out_flat.reshape(B, C, H, W)


def channel_attention_ref(x, w1, b1, w2, b2):
    """Pure-JAX reference mirroring the PyTorch forward (computed in f32)."""
    xf = x.astype(jnp.float32)
    avg = jnp.mean(xf, axis=(2, 3))                   # (B, C)
    mx = jnp.max(xf, axis=(2, 3))                     # (B, C)

    def mlp(v):
        h = jnp.maximum(v @ w1.T + b1, 0.0)
        return h @ w2.T + b2

    gate = jax.nn.sigmoid(mlp(avg) + mlp(mx))         # (B, C)
    return gate[:, :, None, None] * xf


if __name__ == "__main__":
    key = jax.random.PRNGKey(0)
    kx, k1, k2, k3, k4 = jax.random.split(key, 5)

    B, C = 2, 32
    reduction_ratio = 16
    Ch = C // reduction_ratio                         # hidden = 2

    # PyTorch Linear default init: U(-1/sqrt(fan_in), +1/sqrt(fan_in)).
    lim1 = 1.0 / (C ** 0.5)
    lim2 = 1.0 / (Ch ** 0.5)
    w1 = jax.random.uniform(k1, (Ch, C), jnp.float32, -lim1, lim1)   # fc[0].weight
    b1 = jax.random.uniform(k2, (Ch,), jnp.float32, -lim1, lim1)     # fc[0].bias
    w2 = jax.random.uniform(k3, (C, Ch), jnp.float32, -lim2, lim2)   # fc[2].weight
    b2 = jax.random.uniform(k4, (C,), jnp.float32, -lim2, lim2)      # fc[2].bias

    # 1) f32, fast fused path.
    x = jax.random.normal(kx, (B, C, 16, 16), dtype=jnp.float32)
    out = jax.block_until_ready(channel_attention(x, w1, b1, w2, b2))
    ref = channel_attention_ref(x, w1, b1, w2, b2)
    assert out.shape == x.shape
    assert jnp.allclose(out, ref, atol=1e-5, rtol=1e-5), "f32 fused path mismatch"

    # 2) f32, forced chunked fallback path (ragged last spatial chunk: 169 = 128 + 41).
    x2 = jax.random.normal(kx, (B, C, 13, 13), dtype=jnp.float32)
    out2 = jax.block_until_ready(
        channel_attention(x2, w1, b1, w2, b2, block_budget_bytes=1024))
    ref2 = channel_attention_ref(x2, w1, b1, w2, b2)
    assert jnp.allclose(out2, ref2, atol=1e-5, rtol=1e-5), "chunked path mismatch"

    # 3) bf16, fast fused path (pooling/MLP/sigmoid in f32, gating multiply in bf16).
    xb = x.astype(jnp.bfloat16)
    out3 = jax.block_until_ready(channel_attention(xb, w1, b1, w2, b2))
    ref3 = channel_attention_ref(xb, w1, b1, w2, b2)
    assert jnp.allclose(out3.astype(jnp.float32), ref3, atol=3e-2, rtol=3e-2), \
        "bf16 path mismatch"

    print("KERNEL_OK")
</pallas_src>

<mosaic_0001>
module attributes {stable_mosaic.version = 11 : i64} {
  func.func @_ca_fused_kernel(%arg0: i32, %arg1: memref<1x32x256xf32, #tpu.memory_space<vmem>>, %arg2: memref<32x2xf32, #tpu.memory_space<vmem>>, %arg3: memref<1x2xf32, #tpu.memory_space<vmem>>, %arg4: memref<2x32xf32, #tpu.memory_space<vmem>>, %arg5: memref<1x32xf32, #tpu.memory_space<vmem>>, %arg6: memref<1x32x256xf32, #tpu.memory_space<vmem>>) attributes {dimension_semantics = [#tpu.dimension_semantics<parallel>], iteration_bounds = array<i64: 2>, scalar_prefetch = 0 : i64, scratch_operands = 0 : i64, tpu.core_type = #tpu.core_type<tc>, window_params = [{transform_indices = @transform_0, window_bounds = array<i64: 1, 32, 256>}, {pipeline_mode = #tpu.pipeline_mode<synchronous>, transform_indices = @transform_1, window_bounds = array<i64: 32, 2>}, {pipeline_mode = #tpu.pipeline_mode<synchronous>, transform_indices = @transform_2, window_bounds = array<i64: 1, 2>}, {pipeline_mode = #tpu.pipeline_mode<synchronous>, transform_indices = @transform_3, window_bounds = array<i64: 2, 32>}, {pipeline_mode = #tpu.pipeline_mode<synchronous>, transform_indices = @transform_4, window_bounds = array<i64: 1, 32>}, {transform_indices = @transform_5, window_bounds = array<i64: 1, 32, 256>}]} {
    %c0 = arith.constant 0 : index
    %c0_0 = arith.constant 0 : index
    %c0_1 = arith.constant 0 : index
    %0 = vector.load %arg1[%c0, %c0_0, %c0_1] : memref<1x32x256xf32, #tpu.memory_space<vmem>>, vector<1x32x256xf32>
    %cst = arith.constant dense<0.000000e+00> : vector<1x32xf32>
    %1 = vector.multi_reduction <add>, %0, %cst [2] : vector<1x32x256xf32> to vector<1x32xf32>
    %c0_2 = arith.constant 0 : index
    %c0_3 = arith.constant 0 : index
    %c0_4 = arith.constant 0 : index
    %2 = vector.load %arg1[%c0_2, %c0_3, %c0_4] : memref<1x32x256xf32, #tpu.memory_space<vmem>>, vector<1x32x256xf32>
    %cst_5 = arith.constant dense<0xFF800000> : vector<1x32xf32>
    %3 = vector.multi_reduction <maximumf>, %2, %cst_5 [2] : vector<1x32x256xf32> to vector<1x32xf32>
    %cst_6 = arith.constant 3.906250e-03 : f32
    %4 = vector.broadcast %cst_6 : f32 to vector<1x32xf32>
    %5 = arith.mulf %1, %4 : vector<1x32xf32>
    %c0_7 = arith.constant 0 : index
    %c0_8 = arith.constant 0 : index
    %6 = vector.load %arg2[%c0_7, %c0_8] : memref<32x2xf32, #tpu.memory_space<vmem>>, vector<32x2xf32>
    %c0_9 = arith.constant 0 : index
    %c0_10 = arith.constant 0 : index
    %7 = vector.load %arg3[%c0_9, %c0_10] : memref<1x2xf32, #tpu.memory_space<vmem>>, vector<1x2xf32>
    %c0_11 = arith.constant 0 : index
    %c0_12 = arith.constant 0 : index
    %8 = vector.load %arg4[%c0_11, %c0_12] : memref<2x32xf32, #tpu.memory_space<vmem>>, vector<2x32xf32>
    %c0_13 = arith.constant 0 : index
    %c0_14 = arith.constant 0 : index
    %9 = vector.load %arg5[%c0_13, %c0_14] : memref<1x32xf32, #tpu.memory_space<vmem>>, vector<1x32xf32>
    %cst_15 = arith.constant dense<0.000000e+00> : vector<1x2xf32>
    %10 = tpu.matmul %5, %6, %cst_15 {dimension_numbers = #tpu.dot_dimension_numbers<[1], [0], [0], [1], [0, 0, 1, 1], [], []>} : vector<1x32xf32>, vector<32x2xf32>, vector<1x2xf32> -> vector<1x2xf32>
    %11 = arith.addf %10, %7 : vector<1x2xf32>
    %cst_16 = arith.constant 0.000000e+00 : f32
    %12 = vector.broadcast %cst_16 : f32 to vector<1x2xf32>
    %13 = arith.maximumf %11, %12 : vector<1x2xf32>
    %cst_17 = arith.constant dense<0.000000e+00> : vector<1x32xf32>
    %14 = tpu.matmul %13, %8, %cst_17 {dimension_numbers = #tpu.dot_dimension_numbers<[1], [0], [0], [1], [0, 0, 1, 1], [], []>} : vector<1x2xf32>, vector<2x32xf32>, vector<1x32xf32> -> vector<1x32xf32>
    %15 = arith.addf %14, %9 : vector<1x32xf32>
    %cst_18 = arith.constant dense<0.000000e+00> : vector<1x2xf32>
    %16 = tpu.matmul %3, %6, %cst_18 {dimension_numbers = #tpu.dot_dimension_numbers<[1], [0], [0], [1], [0, 0, 1, 1], [], []>} : vector<1x32xf32>, vector<32x2xf32>, vector<1x2xf32> -> vector<1x2xf32>
    %17 = arith.addf %16, %7 : vector<1x2xf32>
    %cst_19 = arith.constant 0.000000e+00 : f32
    %18 = vector.broadcast %cst_19 : f32 to vector<1x2xf32>
    %19 = arith.maximumf %17, %18 : vector<1x2xf32>
    %cst_20 = arith.constant dense<0.000000e+00> : vector<1x32xf32>
    %20 = tpu.matmul %19, %8, %cst_20 {dimension_numbers = #tpu.dot_dimension_numbers<[1], [0], [0], [1], [0, 0, 1, 1], [], []>} : vector<1x2xf32>, vector<2x32xf32>, vector<1x32xf32> -> vector<1x32xf32>
    %21 = arith.addf %20, %9 : vector<1x32xf32>
    %22 = arith.addf %15, %21 : vector<1x32xf32>
    %23 = arith.negf %22 : vector<1x32xf32>
    %24 = math.exp %23 : vector<1x32xf32>
    %cst_21 = arith.constant 1.000000e+00 : f32
    %25 = vector.broadcast %cst_21 : f32 to vector<1x32xf32>
    %26 = arith.addf %25, %24 : vector<1x32xf32>
    %27 = arith.divf %25, %26 : vector<1x32xf32>
    %c0_22 = arith.constant 0 : index
    %c0_23 = arith.constant 0 : index
    %c0_24 = arith.constant 0 : index
    %28 = vector.load %arg1[%c0_22, %c0_23, %c0_24] : memref<1x32x256xf32, #tpu.memory_space<vmem>>, vector<1x32x256xf32>
    %29 = vector.shape_cast %27 : vector<1x32xf32> to vector<1x32x1xf32>
    %30 = vector.broadcast %29 : vector<1x32x1xf32> to vector<1x32x256xf32>
    %31 = arith.mulf %28, %30 : vector<1x32x256xf32>
    %c0_25 = arith.constant 0 : index
    %c0_26 = arith.constant 0 : index
    %c0_27 = arith.constant 0 : index
    %32 = vector.load %arg6[%c0_25, %c0_26, %c0_27] : memref<1x32x256xf32, #tpu.memory_space<vmem>>, vector<1x32x256xf32>
    tpu.vector_store %arg6[%c0_25, %c0_26, %c0_27], %31 {strides = array<i32>} : memref<1x32x256xf32, #tpu.memory_space<vmem>>, vector<1x32x256xf32>,
    return
  }
  func.func @transform_0(%arg0: i32) -> (i32, i32, i32) {
    %c0_i32 = arith.constant 0 : i32
    %c0_i32_0 = arith.constant 0 : i32
    %c0_i32_1 = arith.constant 0 : i32
    return %arg0, %c0_i32, %c0_i32_0 : i32, i32, i32
  }
  func.func @transform_1(%arg0: i32) -> (i32, i32) {
    %c0_i32 = arith.constant 0 : i32
    %c0_i32_0 = arith.constant 0 : i32
    %c0_i32_1 = arith.constant 0 : i32
    return %c0_i32, %c0_i32_0 : i32, i32
  }
  func.func @transform_2(%arg0: i32) -> (i32, i32) {
    %c0_i32 = arith.constant 0 : i32
    %c0_i32_0 = arith.constant 0 : i32
    %c0_i32_1 = arith.constant 0 : i32
    return %c0_i32, %c0_i32_0 : i32, i32
  }
  func.func @transform_3(%arg0: i32) -> (i32, i32) {
    %c0_i32 = arith.constant 0 : i32
    %c0_i32_0 = arith.constant 0 : i32
    %c0_i32_1 = arith.constant 0 : i32
    return %c0_i32, %c0_i32_0 : i32, i32
  }
  func.func @transform_4(%arg0: i32) -> (i32, i32) {
    %c0_i32 = arith.constant 0 : i32
    %c0_i32_0 = arith.constant 0 : i32
    %c0_i32_1 = arith.constant 0 : i32
    return %c0_i32, %c0_i32_0 : i32, i32
  }
  func.func @transform_5(%arg0: i32) -> (i32, i32, i32) {
    %c0_i32 = arith.constant 0 : i32
    %c0_i32_0 = arith.constant 0 : i32
    %c0_i32_1 = arith.constant 0 : i32
    return %arg0, %c0_i32, %c0_i32_0 : i32, i32, i32
  }
}

</mosaic_0001>

<bundles_post_ra>
// kernel: tpu_custom_call.1
= control target key start
LH: loop header
LB: loop body
LE: loop exit
PB: predicated region body
PF: predicated region fallthrough
CT: control target
= control target key end

     0   :  { %10 = vsyncpa [#allocation3], 0  ;;  %s1294_s0 = inlined_call_operand.hbm [shape: f32[2,32,256], index: 0, kind: input, shape index: {}]   ;;  %s1295_s1 = inlined_call_operand.vmem [shape: f32[32,2], index: 1, kind: input, shape index: {}]   ;;  %s1296_s2 = inlined_call_operand.vmem [shape: f32[1,2], index: 2, kind: input, shape index: {}]   ;;  %s1297_s3 = inlined_call_operand.vmem [shape: f32[2,32], index: 3, kind: input, shape index: {}]   ;;  %s1298_s4 = inlined_call_operand.vmem [shape: f32[1,32], index: 4, kind: input, shape index: {}]   ;;  %s1299_s5 = inlined_call_operand.hbm [shape: f32[2,32,256], index: 5, kind: output, shape index: {}]  }
   0x1   :  { %12 = vsyncpa [#allocation3 + $0x1], 0 }
   0x2   :  { %13 = vsyncpa [#allocation4], 0 }
   0x3   :  { %15 = vsyncpa [#allocation4 + $0x1], 0  ;;  %s1024_s18 = smov 0   ;;  %s1026_s19 = smov 0  }
   0x4   :  { %s1028_s20 = smov 0   ;;  %s1030_s21 = smov 0  }
   0x5 LB: > { %s1045_s22 = sadd.s32 4294967295, %s984_s21   ;;  %s767_s23 = sadd.s32 4294967294, %s984_s21   ;;  %s984_s21 = sphi %s1030_s21, %s1314_s21   ;;  %s980_s20 = sphi %s1028_s20, %s1313_s20   ;;  %s976_s19 = sphi %s1026_s19, %s1312_s19   ;;  %s972_s18 = sphi %s1024_s18, %s1311_s18  }
   0x6   : > { %s1049_s24 = sadd.s32 1, %s984_s21   ;;  %s28_s25 = sadd.s32 1, %s980_s20 }
   0x7   : > { %s25_s26 = ssub.s32 %s984_s21, %s1049_s24  ;;  %p35_p0 = scmp.ne.s32.totalorder %s980_s20, %s976_s19 }
   0x8   : > { %p26_p1 = scmp.eq.s32.totalorder %s25_s26, 0  ;;  %p36_p2 = scmp.eq.s32.totalorder %s984_s21, 0 }
   0x9   : > { %p41_p3 = scmp.ne.s32.totalorder %s976_s19, %s972_s18  ;;  %p42_p4 = scmp.eq.s32.totalorder %s1045_s22, 0 }
   0xa   : > { %s1061_s27 = scalar_select %p26_p1, %s980_s20, %s28_s25  }
   0xb   : > { %p1063_p5 = por %p36_p2, %p35_p0  ;;  %p1067_p6 = por %p42_p4, %p41_p3 }
   0xc   : > { %p149_p7 = scmp.eq.s32.totalorder %s1045_s22, 1  ;;  %p155_p8 = scmp.eq.s32.totalorder %s767_s23, 1 }
   0xd   : > { %s1303_s29 = scalar_select %p1067_p6, 1, 0 }
   0xe   : > { %p848_p10 = scmp.lt.s32.totalorder %s984_s21, 2  ;;  %p1074_p11 = por %p149_p7, %p35_p0 }
   0xf   : > { %p1078_p12 = por %p155_p8, %p41_p3  ;;  %s187_s7 = sand.u32 1, %s980_s20  }
  0x10   : > { %s1304_s30 = scalar_select %p1074_p11, 1, 0 }
  0x11   : > { %s1305_s6 = scalar_select %p1078_p12, 1, 0 }
  0x12   : > { %s788_s8 = sshll.u32 %s984_s21, 10  ;;  %s770_s9 = sshll.u32 %s187_s7, 6 }
  0x13   : > { %s1087_s12 = scalar_lea.hbm %s1294_s0, %s788_s8  ;;  %s191_s13 = scalar_lea.vmem [#allocation2], %s770_s9 }
  0x14   : > { %s198_s14 = sshll.u32 %s191_s13, 4  ;;  %p1091_p13 = pnand %p848_p10, %p1063_p5  ;;  %s1095_s14 = int_to_ptr.vmem [resolvable:$true] %s198_s14 }
  0x15   : > { %s1097_s16 = scalar_lea.sflag [#allocation3], %s187_s7  ;;  %s892_s17 = scalar_lea.hbm %s1087_s12, 1024 }
  0x16   : > { %p893_p0 = scmp.ne.s32.totalorder %s1087_s12, %s892_s17  ;;  %p894_p1 = pneg %p1091_p13 }
  0x17   : > { %s897_s26 = scalar_lea.hbm %s1294_s0, 2048  ;;  %p898_p4 = scmp.lt.s32.totalorder %s1087_s12, %s1294_s0 }
  0x18   : > { %p895_p2 = pnand %p894_p1, %p893_p0  ;;  %p899_p5 = scmp.lt.s32.totalorder %s897_s26, %s892_s17 }
  0x1a   : > { %p896_p3 = pneg %p895_p2  ;;  %p900_p7 = por %p899_p5, %p898_p4 }
  0x1c   : > { %p901_p8 = pnand %p900_p7, %p896_p3 }
  0x1e   : > { %904 = shalt.err (!%p901_p8)
}
  0x1f   : > { %s905_s7 = scalar_lea.vmem %s1095_s14, 1024  ;;  %s986_s9 = smov [#allocation2]  }
  0x20   : > { %p906_p10 = scmp.ne.s32.totalorder %s1095_s14, %s905_s7  ;;  %s910_s10 = sshll.u32 %s986_s9, 4  ;;  %s911_s10 = int_to_ptr.vmem [resolvable:$false] %s910_s10 }
  0x21   : > { %s912_s11 = scalar_lea.vmem %s911_s10, 2048  ;;  %p913_p2 = scmp.lt.s32.totalorder %s1095_s14, %s911_s10 }
  0x22   : > { %p908_p9 = pnand %p906_p10, %p894_p1  ;;  %p914_p12 = scmp.lt.s32.totalorder %s912_s11, %s905_s7 }
  0x24   : > { %p909_p0 = pneg %p908_p9  ;;  %p915_p11 = por %p914_p12, %p913_p2 }
  0x26   : > { %p916_p6 = pnand %p915_p11, %p909_p0 }
  0x28   : > { %919 = shalt.err (!%p916_p6)
}
  0x29   : > { %s987_s13 = smov 256   ;;  %s988_s17 = smov 16  }
  0x2a   : > { %843 = dma.hbm_to_vmem [thread:$0]  (!%p1091_p13), %s1087_s12, 1024, %s1095_s14, %s1097_s16, %s987_s13, %s987_s13, %s988_s17  }
  0x2b   : > { %p773_p9 = scmp.ge.s32.totalorder %s984_s21, 1  ;;  %p206_p1 = scmp.lt.s32.totalorder %s984_s21, 3 }
  0x2d   : > { %p207_p3 = pnand %p773_p9, %p206_p1 }
  0x2e   : > { %s1121_s23 = sand.u32 (!%p207_p3), 1, %s976_s19   ;;  %p1307_p6 = scmp.ne.s32.totalorder (!%p207_p3), %s1303_s29, 0 }
  0x2f   : > { %210 = sbr.rel (%p207_p3) target bundleno = 977 (0x3d1), region = 40  ;;  %s774_s25 = sshll.u32 (!%p207_p3), %s1121_s23, 6 }
  0x30   : > { %s213_s26 = scalar_lea.sflag (!%p207_p3), [#allocation3], %s1121_s23  ;;  %s216_s28 = scalar_lea.vmem (!%p207_p3), [#allocation2], %s774_s25 }
  0x34   : > { %963 = dma.done.wait (%p1307_p6), %s213_s26, 1024  }
  0x35   : > { %965 = vsyncadd (%p1307_p6), %s213_s26, 4294966272  ;;  %v1131_v0 = vld [vmem:[%s216_s28] sm:$0xff]  ;;  %v1133_v1 = vld [vmem:[%s216_s28 + $0x8] sm:$0xff]  ;;  %v989_v12 = vmov 0.0   ;;  %vm990_vm0 = vmmov 0   ;;  %v290_v21 = vlaneseq  ;;  %vm301_vm1 = vcmask 130112  }
  0x36   : > { %v1135_v2 = vld [vmem:[%s216_s28 + $0x20] sm:$0xff]  ;;  %v251_v3 = vadd.f32 %v1133_v1, %v1131_v0  ;;  %v1139_v4 = vld [vmem:[%s216_s28 + $0x28] sm:$0xff]  ;;  %v1141_v5 = vld [vmem:[%s216_s28 + $0x10] sm:$0xff]  ;;  %804 = vmatprep.subr.mxu0 %v989_v12  ;;  %815 = vmatprep.subr.mxu1 %v989_v12  ;;  %v263_v17 = vmax.f32 %v1131_v0, %v1133_v1  ;;  %vm308_vm2 = vcmask 195712   ;;  %vm315_vm3 = vcmask 261312   ;;  %s242_s29 = scalar_lea.vmem [#allocation5], %s774_s25 }
  0x37   : > { %v1143_v6 = vld [vmem:[%s216_s28 + $0x18] sm:$0xff]  ;;  %v257_v7 = vadd.f32 %v1139_v4, %v1135_v2  ;;  %v1147_v8 = vld [vmem:[%s216_s28 + $0x30] sm:$0xff]  ;;  %v1174_v15 = vld [vmem:[%s1295_s1 + $0x8] sm:$0xff]  ;;  %812 = vmatprep.mubr.msk.f32.mxu0 %vm990_vm0, %v989_v12  ;;  %817 = vmatprep.mubr.msk.f32.mxu1 %vm990_vm0, %v989_v12  ;;  %v269_v19 = vmax.f32 %v1135_v2, %v1139_v4  ;;  %v291_v22 = vand.u32 127, %v290_v21  ;;  %v1197_v23 = vshrl.u32 %v290_v21, 7  ;;  %s694_s12 = sshll.u32 %s242_s29, 4  ;;  %s1244_s12 = int_to_ptr.vmem [resolvable:$true] %s694_s12 }
  0x38   : > { %v1149_v9 = vld [vmem:[%s216_s28 + $0x38] sm:$0xff]  ;;  %252 = vadd.xlane.f32.xlu0 %v251_v3  ;;  %v254_v10 = vadd.f32 %v1143_v6, %v1141_v5  ;;  %v1167_v14 = vld [vmem:[%s1295_s1 + $0x10] sm:$0xff]  ;;  %v1180_v16 = vld [vmem:[%s1295_s1] sm:$0xff]  ;;  %v266_v18 = vmax.f32 %v1141_v5, %v1143_v6  ;;  %vm317_vm4 = vcmask 261120   ;;  %vm395_vm5 = vcmask 1041408   ;;  %s789_s14 = sshll.u32 %s1045_s22, 10 }
  0x39   : > { %258 = vadd.xlane.f32.xlu1 %v257_v7  ;;  %v260_v11 = vadd.f32 %v1149_v9, %v1147_v8  ;;  %v1159_v13 = vld [vmem:[%s1295_s1 + $0x18] sm:$0xff]  ;;  %v272_v20 = vmax.f32 %v1147_v8, %v1149_v9  ;;  %v296_v24 = vadd.s32 4294967288, %v291_v22  ;;  %v303_v26 = vadd.s32 4294967280, %v291_v22  ;;  %v284_v46 = vld [vmem:[%s1297_s3] sm:$0x3]  ;;  %s1249_s16 = scalar_lea.hbm %s1299_s5, %s789_s14  ;;  %s681_s22 = scalar_lea.sflag [#allocation4], %s1121_s23 }
  0x3a   : > { %805 = vmatpush3.msra.mxu0 %v1159_v13  ;;  %v310_v27 = vadd.s32 4294967272, %v291_v22  ;;  %v294_v29 = vsub.s32 %v291_v22, %v1197_v23  ;;  %816 = vmatpush3.msk.msra.mxu1 %vm395_vm5, %v284_v46  ;;  %v283_v48 = vld [vmem:[%s1296_s2] sm:$0x1]  ;;  %vm391_vm6 = vcmask 15360   ;;  %v647_v22 = vsub.s32 0, %v1197_v23  ;;  %s920_s8 = scalar_lea.vmem %s1244_s12, 1024 }
  0x3b   : > { %806 = vmatprep.subr.mxu0 %v989_v12  ;;  %v299_v31 = vsub.s32 %v296_v24, %v1197_v23  ;;  %v306_v32 = vsub.s32 %v303_v26, %v1197_v23  ;;  %820 = vmatprep.subr.mxu1 %v989_v12  ;;  %p921_p11 = scmp.ne.s32.totalorder %s1244_s12, %s920_s8  ;;  %p1308_p12 = scmp.ne.s32.totalorder %s1304_s30, 0 }
  0x3c   : > { %255 = vadd.xlane.f32.xlu0 %v254_v10  ;;  %807 = vmatpush3.msra.mxu0 %v1167_v14  ;;  %v313_v35 = vsub.s32 %v310_v27, %v1197_v23  ;;  %s991_s7 = smov [#allocation5]  }
  0x3d   : > { %261 = vadd.xlane.f32.xlu1 %v260_v11  ;;  %808 = vmatprep.subr.mxu0 %v989_v12  ;;  %p922_p13 = pnand %p921_p11, %p1308_p12  ;;  %s924_s9 = sshll.u32 %s991_s7, 4  ;;  %s925_s9 = int_to_ptr.vmem [resolvable:$false] %s924_s9 }
  0x3e   : > { %809 = vmatpush3.msra.mxu0 %v1174_v15  ;;  %s926_s10 = scalar_lea.vmem %s925_s9, 2048  ;;  %p927_p5 = scmp.lt.s32.totalorder %s1244_s12, %s925_s9 }
  0x3f   : > { %810 = vmatprep.subr.mxu0 %v989_v12  ;;  %p923_p4 = pneg %p922_p13  ;;  %p928_p7 = scmp.lt.s32.totalorder %s926_s10, %s920_s8 }
  0x40   : > { %811 = vmatpush3.msra.mxu0 %v1180_v16  ;;  %264 = vmax.xlane.f32.xlu0 %v263_v17 }
  0x41   : > { %831 = vmatprep.subr.mxu0 %v989_v12  ;;  %267 = vmax.xlane.f32.xlu1 %v266_v18  ;;  %p929_p8 = por %p928_p7, %p927_p5 }
  0x43   : > { %p930_p10 = pnand %p929_p8, %p923_p4 }
  0x44   : > { %270 = vmax.xlane.f32.xlu0 %v269_v19 }
  0x45   : > { %273 = vmax.xlane.f32.xlu1 %v272_v20 }
  0xc1   : > { %v253_v25 = vpop.xlane.xlu0 %252 }
  0xc2   : > { %v259_v28 = vpop.xlane.xlu1 %258  ;;  %v275_v30 = vmul.f32 0.00390625, %v253_v25 }
  0xc3   : > { %v277_v33 = vmul.f32 0.00390625, %v259_v28 }
  0xc4   : > { %v295_v39 = vrot.slane %v275_v30, %v294_v29 }
  0xc5   : > { %v256_v34 = vpop.xlane.xlu0 %255  ;;  %v307_v41 = vrot.slane %v277_v33, %v306_v32 }
  0xc6   : > { %v276_v36 = vmul.f32 0.00390625, %v256_v34  ;;  %v262_v37 = vpop.xlane.xlu1 %261 }
  0xc7   : > { %v278_v38 = vmul.f32 0.00390625, %v262_v37 }
  0xc8   : > { %v300_v40 = vrot.slane %v276_v36, %v299_v31 }
  0xc9   : > { %v314_v42 = vrot.slane %v278_v38, %v313_v35  ;;  %v265_v47 = vpop.xlane.xlu0 %264 }
  0xca   : > { %v302_v43 = vsel %vm301_vm1, %v300_v40, %v295_v39  ;;  %v268_v49 = vpop.xlane.xlu1 %267  ;;  %v476_v52 = vrot.slane %v265_v47, %v294_v29 }
  0xcb   : > { %v309_v44 = vsel %vm308_vm2, %v307_v41, %v302_v43  ;;  %v480_v53 = vrot.slane %v268_v49, %v299_v31 }
  0xcc   : > { %v316_v45 = vsel %vm315_vm3, %v314_v42, %v309_v44 }
  0xcd   : > { %813 = vmatmul.mubr.msk.f32.vlgmr.msra.gmra.mxu0 %vm317_vm4, %v316_v45  ;;  %v271_v55 = vpop.xlane.xlu0 %270  ;;  %v481_v59 = vsel %vm301_vm1, %v480_v53, %v476_v52 }
  0xce   : > { %833 = vmatprep.mubr.msk.f32.mxu0 %vm990_vm0, %v989_v12  ;;  %832 = vmatpush3.msk.msra.mxu0 %vm395_vm5, %v284_v46  ;;  %v485_v57 = vrot.slane %v271_v55, %v306_v32  ;;  %v274_v58 = vpop.xlane.xlu1 %273 }
  0xcf   : > { %v490_v60 = vrot.slane %v274_v58, %v313_v35 }
  0xd0   : > { %v486_v61 = vsel %vm308_vm2, %v485_v57, %v481_v59 }
  0xd1   : > { %v491_v62 = vsel %vm315_vm3, %v490_v60, %v486_v61 }
 0x18d   : > { %v386_v50 = vpop.f32.mrf.mxu0 }
 0x18e   : > { %v387_v51 = vadd.f32 %v386_v50, %v283_v48 }
 0x18f   : > { %v814_v54 = vpop.f32.mrf.mxu0 }
 0x190   : > { %v390_v56 = vmax.f32 %v387_v51, 0.0 }
 0x192   : > { %818 = vmatmul.mubr.msk.f32.vlgmr.msra.gmra.mxu1 %vm391_vm6, %v390_v56 }
 0x193   : > { %821 = vmatpush3.msra.mxu1 %v1159_v13  ;;  %828 = vmatprep.mubr.msk.f32.mxu1 %vm990_vm0, %v989_v12 }
 0x194   : > { %822 = vmatprep.subr.mxu1 %v989_v12 }
 0x195   : > { %823 = vmatpush3.msra.mxu1 %v1167_v14  ;;  %v285_v14 = vld [vmem:[%s1298_s4] sm:$0x1] }
 0x196   : > { %824 = vmatprep.subr.mxu1 %v989_v12 }
 0x197   : > { %825 = vmatpush3.msra.mxu1 %v1174_v15 }
 0x198   : > { %826 = vmatprep.subr.mxu1 %v989_v12 }
 0x199   : > { %827 = vmatpush3.msra.mxu1 %v1180_v16 }
 0x19a   : > { %829 = vmatmul.mubr.msk.f32.vlgmr.msra.gmra.mxu1 %vm317_vm4, %v491_v62 }
 0x252   : > { %v465_v63 = vpop.f32.mrf.mxu1 }
 0x253   : > { %v466_v12 = vadd.f32 %v465_v63, %v285_v14 }
 0x254   : > { %v819_v3 = vpop.f32.mrf.mxu1 }
 0x25a   : > { %v560_v7 = vpop.f32.mrf.mxu1 }
 0x25b   : > { %v561_v10 = vadd.f32 %v560_v7, %v283_v48 }
 0x25c   : > { %v830_v11 = vpop.f32.mrf.mxu1 }
 0x25d   : > { %v564_v13 = vmax.f32 %v561_v10, 0.0 }
 0x25f   : > { %834 = vmatmul.mubr.msk.f32.vlgmr.msra.gmra.mxu0 %vm391_vm6, %v564_v13 }
 0x31f   : > { %v634_v15 = vpop.f32.mrf.mxu0 }
 0x320   : > { %v635_v17 = vadd.f32 %v634_v15, %v285_v14 }
 0x321   : > { %v835_v18 = vpop.f32.mrf.mxu0 }
 0x322   : > { %v638_v19 = vadd.f32 %v635_v17, %v466_v12 }
 0x324   : > { %v782_v16 = vmul.f32 -1.442695, %v638_v19 }
 0x326   : > { %888 = vpow2.f32 %v782_v16 }
 0x333   : > { %v889_v20 = vpop.eup %888 }
 0x334   : > { %v642_v21 = vadd.f32 1.0, %v889_v20 }
 0x336   : > { %890 = vrcp.f32 %v642_v21 }
 0x343   : > { %v891_v24 = vpop.eup %890 }
 0x344   : > { %v648_v25 = vrot.slane %v891_v24, %v647_v22 }
 0x346   : > { %654 = vbcast.lane.b32.xlu1 %v648_v25, 264  ;;  %650 = vbcast.lane.b32.xlu0 %v648_v25, 256 }
 0x34a   : > { %658 = vbcast.lane.b32.xlu1 %v648_v25, 272 }
 0x34e   : > { %662 = vbcast.lane.b32.xlu1 %v648_v25, 280 }
 0x3b8   : > { %v655_v26 = vpop.permute.xlu1 %654  ;;  %v651_v27 = vpop.permute.xlu0 %650 }
 0x3b9   : > { %v666_v28 = vmul.f32 %v655_v26, %v1141_v5  ;;  %v667_v29 = vmul.f32 %v655_v26, %v1143_v6  ;;  %v664_v30 = vmul.f32 %v651_v27, %v1131_v0  ;;  %v665_v31 = vmul.f32 %v651_v27, %v1133_v1 }
 0x3bb   : > { %674 = vst [vmem:[%s242_s29 + $0x10] sm:$0xff] %v666_v28  ;;  %675 = vst [vmem:[%s242_s29 + $0x18] sm:$0xff] %v667_v29 }
 0x3bc   : > { %672 = vst [vmem:[%s242_s29] sm:$0xff] %v664_v30  ;;  %673 = vst [vmem:[%s242_s29 + $0x8] sm:$0xff] %v665_v31  ;;  %v659_v23 = vpop.permute.xlu1 %658 }
 0x3bd   : > { %v668_v32 = vmul.f32 %v659_v23, %v1135_v2  ;;  %v669_v5 = vmul.f32 %v659_v23, %v1139_v4 }
 0x3bf   : > { %676 = vst [vmem:[%s242_s29 + $0x20] sm:$0xff] %v668_v32  ;;  %677 = vst [vmem:[%s242_s29 + $0x28] sm:$0xff] %v669_v5 }
 0x3c0   : > { %v663_v0 = vpop.permute.xlu1 %662 }
 0x3c1   : > { %v670_v1 = vmul.f32 %v663_v0, %v1147_v8  ;;  %v671_v2 = vmul.f32 %v663_v0, %v1149_v9 }
 0x3c3   : > { %678 = vst [vmem:[%s242_s29 + $0x30] sm:$0xff] %v670_v1  ;;  %679 = vst [vmem:[%s242_s29 + $0x38] sm:$0xff] %v671_v2 }
 0x3c4   : > { %933 = shalt.err (!%p930_p10)
}
 0x3c5   : > { %s934_s11 = scalar_lea.hbm %s1249_s16, 1024  ;;  %s938_s26 = scalar_lea.hbm %s1299_s5, 2048 }
 0x3c6   : > { %p935_p0 = scmp.ne.s32.totalorder %s1249_s16, %s934_s11  ;;  %p939_p1 = scmp.lt.s32.totalorder %s1249_s16, %s1299_s5 }
 0x3c7   : > { %p940_p3 = scmp.lt.s32.totalorder %s938_s26, %s934_s11 }
 0x3c8   : > { %p936_p2 = pnand %p935_p0, %p1308_p12 }
 0x3c9   : > { %p941_p6 = por %p940_p3, %p939_p1 }
 0x3ca   : > { %p937_p9 = pneg %p936_p2 }
 0x3cc   : > { %p942_p11 = pnand %p941_p6, %p937_p9 }
 0x3ce   : > { %945 = shalt.err (!%p942_p11)
}
 0x3cf   : > { %s992_s14 = smov 256   ;;  %s993_s25 = smov 16  }
 0x3d0   : > { %838 = dma.vmem_to_hbm [thread:$0]  (%p1308_p12), %s1244_s12, 1024, %s1249_s16, %s681_s22, %s992_s14, %s992_s14, %s993_s25  }
 0x3d1 PF: > { %s709_s15 = sand.u32 1, %s972_s18   ;;  %p1309_p13 = scmp.ne.s32.totalorder %s1305_s6, 0 }
 0x3d2   : > { %p1310_p4 = scmp.ge.s32.totalorder %s984_s21, 2  ;;  %s710_s8 = scalar_lea.sflag [#allocation4], %s709_s15 }
 0x3d4   : > { %p845_p5 = pnand %p1310_p4, %p1309_p13 }
 0x3d6   : > { %p846_p7 = pneg %p845_p5 }
 0x3d8   : > { %967 = dma.done.wait (%p846_p7), %s710_s8, 1024  }
 0x3d9   : > { %969 = vsyncadd (%p846_p7), %s710_s8, 4294966272  ;;  %p18_p8 = scmp.ge.s32.totalorder %s1049_s24, 4   ;;  %s1311_s18 = smov %s976_s19 }
 0x3da   : > { %s1312_s19 = smov %s980_s20  ;;  %s1313_s20 = smov %s1061_s27 }
 0x3db   : > { %s1314_s21 = smov %s1049_s24  ;;  %20 = sbr.rel (!%p18_p8) target bundleno = 5 (0x5), region = 85 }
 0x3e0   :  { %715 = vsyncpa [#allocation3], 1 }
 0x3e1   :  { %717 = vsyncpa [#allocation3 + $0x1], 1 }
 0x3e2   :  { %718 = vsyncpa [#allocation4], 1 }
 0x3e3   :  { %720 = vsyncpa [#allocation4 + $0x1], 1 }

</bundles_post_ra>
